<compile_context>
chip_gen: v7x
topology: tpu7x:2x2x1
jax: 0.10.0
libtpu: 0.0.40
codegen_flags: <defaults>
</compile_context>

<pallas_src>
import functools

import numpy as np
import jax
import jax.numpy as jnp
from jax.experimental import pallas as pl
from jax.experimental.pallas import tpu as pltpu


HEAD_LANES = 128  # packed head output: [loc 4A | bg A | fg A | (fg-bg) A | pad]


# ----------------------------- anchor helpers (numpy, same as PyTorch module)
def generate_anchor_base(sub_sample=16, ratios=(0.5, 1, 2), anchor_scales=(8, 16, 32)):
    y = sub_sample / 2
    x = sub_sample / 2
    anchor_base = np.zeros((len(ratios) * len(anchor_scales), 4), dtype=np.float32)
    for i in range(len(ratios)):
        for j in range(len(anchor_scales)):
            h = sub_sample * anchor_scales[j] * np.sqrt(ratios[i])
            w = sub_sample * anchor_scales[j] * np.sqrt(1.0 / ratios[i])
            index = i * len(anchor_scales) + j
            anchor_base[index, 0] = y - h / 2.0
            anchor_base[index, 1] = x - w / 2.0
            anchor_base[index, 2] = y + h / 2.0
            anchor_base[index, 3] = x + w / 2.0
    return anchor_base


def generate_anchors(anchor_base, feat_stride, height, width):
    shift_y = np.arange(0, height * feat_stride, feat_stride)
    shift_x = np.arange(0, width * feat_stride, feat_stride)
    shift_x, shift_y = np.meshgrid(shift_x, shift_y)
    shift = np.stack((shift_y.ravel(), shift_x.ravel(),
                      shift_y.ravel(), shift_x.ravel()), axis=1)
    A = anchor_base.shape[0]
    K = shift.shape[0]
    anchor = anchor_base.reshape((1, A, 4)) + shift.reshape((1, K, 4)).transpose((1, 0, 2))
    return anchor.reshape((K * A, 4)).astype(np.float32)


# ----------------------------- Pallas kernel (hot path) ----------------------
def _rpn_kernel(p_ref, w1_ref, b1_ref, wh_ref, bh_ref, out_ref, *, w_out, a):
    # p_ref : (Lp, 3*Cin) bf16 -- full flattened padded image, kx folded into
    #         channels (lanes); Lp = (Hp+2)*w_out, w_out % 8 == 0.
    # w1_ref: (3, 3*Cin, Cmid) bf16 -- conv taps grouped by ky (kx-major inside).
    # b1_ref: (1, Cmid) f32
    # wh_ref: (Cmid, 128) bf16 -- fused heads [loc | bg | fg | fg-bg | 0-pad]
    # bh_ref: (1, 128) f32
    # out_ref: (Lo, 128) f32,  Lo = tile_h * w_out
    lo = out_ref.shape[0]
    t = pl.program_id(1)
    row0 = t * lo                                # multiple of 8 (w_out % 8 == 0)

    # 3x3 conv as 3 accumulating GEMMs (K = 3*Cin) over sublane-aligned
    # ky-shifted windows of the resident flattened image.
    acc = None
    for ky in range(3):
        off = pl.multiple_of(row0 + ky * w_out, 8)
        win = p_ref[pl.ds(off, lo), :]                           # (Lo, 3*Cin) bf16
        part = jnp.dot(win, w1_ref[ky], preferred_element_type=jnp.float32)
        acc = part if acc is None else acc + part

    h = jnp.maximum(acc + b1_ref[...], 0.0).astype(jnp.bfloat16)  # ReLU, bf16 for MXU

    # One fused lane-dense head GEMM (last dim 128 -> unmasked stores).
    packed = jnp.dot(h, wh_ref[...], preferred_element_type=jnp.float32) + bh_ref[...]

    # 2-way softmax fg prob == sigmoid(fg_logit - bg_logit); the logit
    # difference already lives in lanes [6A, 7A).  Evaluate the exact sigmoid
    # only on that band (zero elsewhere) so exp() never sees unbounded loc
    # logits, then select back into the dense 128-lane output block.
    lane = jax.lax.broadcasted_iota(jnp.int32, packed.shape, 1)
    is_fg = (lane >= 6 * a) & (lane < 7 * a)
    d = jnp.where(is_fg, packed, 0.0)
    sig = 1.0 / (1.0 + jnp.exp(-d))
    out_ref[...] = jnp.where(is_fg, sig, packed)


def rpn_forward_pallas(feature_map_nchw, params, feat_stride=16, tile_h=None):
    """feature_map_nchw: (N, Cin, H, W) float32 (PyTorch NCHW convention)."""
    w1, b1, wloc, bloc, wscore, bscore = params
    N, Cin, H, W = feature_map_nchw.shape
    Cmid = w1.shape[-1]
    A = wscore.shape[-1] // 2
    assert 7 * A <= HEAD_LANES

    # --- tiling: pad H up to a multiple of tile_h (never degenerate to 1) ---
    if tile_h is None:
        tile_h = 16
    tile_h = max(1, min(tile_h, H))
    T = -(-H // tile_h)                       # cdiv
    if N * T == 1 and H > 1:                  # keep >=2 grid steps (v7x megacore)
        tile_h = -(-H // 2)
        T = 2
    h_pad = T * tile_h
    w_out = ((W + 7) // 8) * 8                # sublane-aligned padded width
    lp_total = (h_pad + 2) * w_out            # flattened rows per image
    lo = tile_h * w_out                       # output rows per grid step

    # --- layout glue (single extra HBM pass + the 3x kx-fold, all in bf16) ---
    x = jnp.transpose(feature_map_nchw, (0, 2, 3, 1)).astype(jnp.bfloat16)  # (N,H,W,Cin)
    xp = jnp.pad(x, ((0, 0), (1, h_pad - H + 1), (1, w_out + 1 - W), (0, 0)))
    # fold the 3 column (kx) shifts into the channel axis: (N, Hp+2, w_out, 3*Cin)
    xk = jnp.concatenate(
        [xp[:, :, 0:w_out], xp[:, :, 1:w_out + 1], xp[:, :, 2:w_out + 2]], axis=-1)
    xflat = xk.reshape(N, lp_total, 3 * Cin)

    # --- weight prep: ky-grouped conv taps (kx-major, matching the kx fold) ---
    w1_k = w1.reshape(3, 3 * Cin, Cmid).astype(jnp.bfloat16)      # [ky][kx*Cin+c]
    b1_2d = b1.reshape(1, Cmid).astype(jnp.float32)
    # fused lane-dense heads
    wbg, wfg = wscore[:, 0::2], wscore[:, 1::2]                   # score chans are a*2+{bg,fg}
    bbg, bfg = bscore[0::2], bscore[1::2]
    w_heads = jnp.concatenate([wloc, wbg, wfg, wfg - wbg], axis=1)          # (Cmid, 7A)
    w_heads = jnp.pad(w_heads, ((0, 0), (0, HEAD_LANES - 7 * A))).astype(jnp.bfloat16)
    b_heads = jnp.concatenate([bloc, bbg, bfg, bfg - bbg])
    b_heads = jnp.pad(b_heads, (0, HEAD_LANES - 7 * A)).reshape(1, HEAD_LANES)
    b_heads = b_heads.astype(jnp.float32)

    # --- right-sized VMEM request (double-buffered blocks + weights), <=32MiB ---
    est = (2 * lp_total * 3 * Cin * 2                  # input block (bf16) x2 buffers
           + 2 * (9 * Cin * Cmid * 2 + Cmid * 4        # conv taps + bias (x2 buffers)
                  + Cmid * HEAD_LANES * 2 + HEAD_LANES * 4)
           + 2 * lo * HEAD_LANES * 4                   # output block (f32) x2 buffers
           + 4 * lo * max(Cmid, HEAD_LANES) * 4)       # in-flight f32 temporaries
    vmem_limit = max(16 << 20, min(32 << 20, 2 * est + (8 << 20)))

    kernel = functools.partial(_rpn_kernel, w_out=w_out, a=A)

    out = pl.pallas_call(
        kernel,
        out_shape=jax.ShapeDtypeStruct((N, T, lo, HEAD_LANES), jnp.float32),
        grid=(N, T),
        in_specs=[
            # whole flattened image per n; constant along the row-tile axis so
            # it stays resident in VMEM across t.
            pl.BlockSpec((None, lp_total, 3 * Cin), lambda n, t: (n, 0, 0)),
            pl.BlockSpec((3, 3 * Cin, Cmid), lambda n, t: (0, 0, 0)),
            pl.BlockSpec((1, Cmid), lambda n, t: (0, 0)),
            pl.BlockSpec((Cmid, HEAD_LANES), lambda n, t: (0, 0)),
            pl.BlockSpec((1, HEAD_LANES), lambda n, t: (0, 0)),
        ],
        out_specs=pl.BlockSpec((None, None, lo, HEAD_LANES), lambda n, t: (n, t, 0, 0)),
        compiler_params=pltpu.CompilerParams(
            dimension_semantics=("parallel", "parallel"),
            vmem_limit_bytes=int(vmem_limit)),
    )(xflat, w1_k, b1_2d, w_heads, b_heads)

    # --- glue: drop padded rows/cols, unpack lanes to PyTorch layouts ---
    out = out.reshape(N, h_pad, w_out, HEAD_LANES)[:, :H, :W, :]
    out = out.reshape(N, H * W, HEAD_LANES)
    rpn_locs = out[..., :4 * A].reshape(N, H * W * A, 4)
    rpn_scores = jnp.stack(
        [out[..., 4 * A:5 * A], out[..., 5 * A:6 * A]], axis=-1
    ).reshape(N, H * W * A, 2)
    rpn_fg_scores = out[..., 6 * A:7 * A].reshape(N, H * W * A)

    anchor = generate_anchors(generate_anchor_base(sub_sample=16), feat_stride, H, W)

    # TODO(synk): proposal_layer (loc_to_bbox + clip + NMS) omitted: rois /
    # roi_indices are host-side, data-dependent numpy code in the reference.
    return rpn_locs, rpn_scores, rpn_fg_scores, anchor


# ----------------------------- pure-JAX reference (correctness check) --------
def rpn_forward_reference(feature_map_nchw, params):
    w1, b1, wloc, bloc, wscore, bscore = params
    N, Cin, H, W = feature_map_nchw.shape
    A = wscore.shape[-1] // 2
    x = jnp.transpose(feature_map_nchw, (0, 2, 3, 1))
    h = jax.lax.conv_general_dilated(
        x, w1, window_strides=(1, 1), padding="SAME",
        dimension_numbers=("NHWC", "HWIO", "NHWC"))
    h = jax.nn.relu(h + b1)
    loc = jnp.einsum("nhwc,cd->nhwd", h, wloc) + bloc
    score = jnp.einsum("nhwc,cd->nhwd", h, wscore) + bscore
    rpn_locs = loc.reshape(N, -1, 4)
    rpn_scores = score.reshape(N, -1, 2)
    soft = jax.nn.softmax(score.reshape(N, H, W, A, 2), axis=4)
    rpn_fg = soft[..., 1].reshape(N, -1)
    return rpn_locs, rpn_scores, rpn_fg


# ----------------------------- main ------------------------------------------
if __name__ == "__main__":
    # small shapes consistent with the module (in/mid channels shrunk)
    N, Cin, Cmid, H, W = 2, 16, 32, 8, 8
    A = 9                                  # 3 ratios * 3 scales
    feat_stride = 16

    key = jax.random.PRNGKey(0)
    kf, k1, k2, k3 = jax.random.split(key, 4)

    feature_map = jax.random.normal(kf, (N, Cin, H, W), jnp.float32)

    # deterministic parameter init mirroring normal_(0, 0.01) / zero_()
    w1 = jax.random.normal(k1, (3, 3, Cin, Cmid), jnp.float32) * 0.01   # HWIO
    b1 = jnp.zeros((Cmid,), jnp.float32)
    wloc = jax.random.normal(k2, (Cmid, A * 4), jnp.float32) * 0.01     # 1x1 conv as matrix
    bloc = jnp.zeros((A * 4,), jnp.float32)
    wscore = jax.random.normal(k3, (Cmid, A * 2), jnp.float32) * 0.01
    bscore = jnp.zeros((A * 2,), jnp.float32)
    params = (w1, b1, wloc, bloc, wscore, bscore)

    # tile_h=4 -> T=2 row tiles per image, exercising the dynamic-window path
    rpn_locs, rpn_scores, rpn_fg_scores, anchor = rpn_forward_pallas(
        feature_map, params, feat_stride=feat_stride, tile_h=4)
    jax.block_until_ready((rpn_locs, rpn_scores, rpn_fg_scores))

    ref_locs, ref_scores, ref_fg = rpn_forward_reference(feature_map, params)

    # bf16 MXU path -> slightly looser tolerances than pure f32
    np.testing.assert_allclose(np.asarray(rpn_locs), np.asarray(ref_locs),
                               rtol=2e-2, atol=2e-3)
    np.testing.assert_allclose(np.asarray(rpn_scores), np.asarray(ref_scores),
                               rtol=2e-2, atol=2e-3)
    np.testing.assert_allclose(np.asarray(rpn_fg_scores), np.asarray(ref_fg),
                               rtol=2e-2, atol=2e-3)
    assert anchor.shape == (H * W * A, 4)
    assert rpn_locs.shape == (N, H * W * A, 4)
    assert rpn_scores.shape == (N, H * W * A, 2)
    assert rpn_fg_scores.shape == (N, H * W * A)

    print("KERNEL_OK")
</pallas_src>

<mosaic_0001>
module attributes {stable_mosaic.version = 11 : i64} {
  func.func @_rpn_kernel(%arg0: i32, %arg1: i32, %arg2: memref<1x80x48xbf16, #tpu.memory_space<vmem>>, %arg3: memref<3x48x32xbf16, #tpu.memory_space<vmem>>, %arg4: memref<1x32xf32, #tpu.memory_space<vmem>>, %arg5: memref<32x128xbf16, #tpu.memory_space<vmem>>, %arg6: memref<1x128xf32, #tpu.memory_space<vmem>>, %arg7: memref<1x1x32x128xf32, #tpu.memory_space<vmem>>) attributes {dimension_semantics = [#tpu.dimension_semantics<parallel>, #tpu.dimension_semantics<parallel>], iteration_bounds = array<i64: 2, 2>, scalar_prefetch = 0 : i64, scratch_operands = 0 : i64, tpu.core_type = #tpu.core_type<tc>, window_params = [{transform_indices = @transform_0, window_bounds = array<i64: 1, 80, 48>}, {pipeline_mode = #tpu.pipeline_mode<synchronous>, transform_indices = @transform_1, window_bounds = array<i64: 3, 48, 32>}, {pipeline_mode = #tpu.pipeline_mode<synchronous>, transform_indices = @transform_2, window_bounds = array<i64: 1, 32>}, {pipeline_mode = #tpu.pipeline_mode<synchronous>, transform_indices = @transform_3, window_bounds = array<i64: 32, 128>}, {pipeline_mode = #tpu.pipeline_mode<synchronous>, transform_indices = @transform_4, window_bounds = array<i64: 1, 128>}, {transform_indices = @transform_5, window_bounds = array<i64: 1, 1, 32, 128>}]} {
    %c32_i32 = arith.constant 32 : i32
    %0 = arith.muli %arg1, %c32_i32 : i32
    %c0_i32 = arith.constant 0 : i32
    %1 = arith.addi %0, %c0_i32 : i32
    %2 = tpu.assume_multiple %1, 8 : i32
    %c0 = arith.constant 0 : index
    %3 = arith.index_cast %2 : i32 to index
    %c0_0 = arith.constant 0 : index
    %4 = vector.load %arg2[%c0, %3, %c0_0] : memref<1x80x48xbf16, #tpu.memory_space<vmem>>, vector<1x32x48xbf16>
    %5 = vector.shape_cast %4 : vector<1x32x48xbf16> to vector<32x48xbf16>
    %c0_1 = arith.constant 0 : index
    %c0_2 = arith.constant 0 : index
    %c0_3 = arith.constant 0 : index
    %6 = vector.load %arg3[%c0_1, %c0_2, %c0_3] : memref<3x48x32xbf16, #tpu.memory_space<vmem>>, vector<1x48x32xbf16>
    %7 = vector.shape_cast %6 : vector<1x48x32xbf16> to vector<48x32xbf16>
    %cst = arith.constant dense<0.000000e+00> : vector<32x32xf32>
    %8 = tpu.matmul %5, %7, %cst {dimension_numbers = #tpu.dot_dimension_numbers<[1], [0], [0], [1], [0, 0, 1, 1], [], []>} : vector<32x48xbf16>, vector<48x32xbf16>, vector<32x32xf32> -> vector<32x32xf32>
    %c8_i32 = arith.constant 8 : i32
    %9 = arith.addi %0, %c8_i32 : i32
    %10 = tpu.assume_multiple %9, 8 : i32
    %c0_4 = arith.constant 0 : index
    %11 = arith.index_cast %10 : i32 to index
    %c0_5 = arith.constant 0 : index
    %12 = vector.load %arg2[%c0_4, %11, %c0_5] : memref<1x80x48xbf16, #tpu.memory_space<vmem>>, vector<1x32x48xbf16>
    %13 = vector.shape_cast %12 : vector<1x32x48xbf16> to vector<32x48xbf16>
    %c1 = arith.constant 1 : index
    %c0_6 = arith.constant 0 : index
    %c0_7 = arith.constant 0 : index
    %14 = vector.load %arg3[%c1, %c0_6, %c0_7] : memref<3x48x32xbf16, #tpu.memory_space<vmem>>, vector<1x48x32xbf16>
    %15 = vector.shape_cast %14 : vector<1x48x32xbf16> to vector<48x32xbf16>
    %cst_8 = arith.constant dense<0.000000e+00> : vector<32x32xf32>
    %16 = tpu.matmul %13, %15, %cst_8 {dimension_numbers = #tpu.dot_dimension_numbers<[1], [0], [0], [1], [0, 0, 1, 1], [], []>} : vector<32x48xbf16>, vector<48x32xbf16>, vector<32x32xf32> -> vector<32x32xf32>
    %17 = arith.addf %8, %16 : vector<32x32xf32>
    %c16_i32 = arith.constant 16 : i32
    %18 = arith.addi %0, %c16_i32 : i32
    %19 = tpu.assume_multiple %18, 8 : i32
    %c0_9 = arith.constant 0 : index
    %20 = arith.index_cast %19 : i32 to index
    %c0_10 = arith.constant 0 : index
    %21 = vector.load %arg2[%c0_9, %20, %c0_10] : memref<1x80x48xbf16, #tpu.memory_space<vmem>>, vector<1x32x48xbf16>
    %22 = vector.shape_cast %21 : vector<1x32x48xbf16> to vector<32x48xbf16>
    %c2 = arith.constant 2 : index
    %c0_11 = arith.constant 0 : index
    %c0_12 = arith.constant 0 : index
    %23 = vector.load %arg3[%c2, %c0_11, %c0_12] : memref<3x48x32xbf16, #tpu.memory_space<vmem>>, vector<1x48x32xbf16>
    %24 = vector.shape_cast %23 : vector<1x48x32xbf16> to vector<48x32xbf16>
    %cst_13 = arith.constant dense<0.000000e+00> : vector<32x32xf32>
    %25 = tpu.matmul %22, %24, %cst_13 {dimension_numbers = #tpu.dot_dimension_numbers<[1], [0], [0], [1], [0, 0, 1, 1], [], []>} : vector<32x48xbf16>, vector<48x32xbf16>, vector<32x32xf32> -> vector<32x32xf32>
    %26 = arith.addf %17, %25 : vector<32x32xf32>
    %c0_14 = arith.constant 0 : index
    %c0_15 = arith.constant 0 : index
    %27 = vector.load %arg4[%c0_14, %c0_15] : memref<1x32xf32, #tpu.memory_space<vmem>>, vector<1x32xf32>
    %28 = vector.broadcast %27 : vector<1x32xf32> to vector<32x32xf32>
    %29 = arith.addf %26, %28 : vector<32x32xf32>
    %cst_16 = arith.constant 0.000000e+00 : f32
    %30 = vector.broadcast %cst_16 : f32 to vector<32x32xf32>
    %31 = arith.maximumf %29, %30 : vector<32x32xf32>
    %32 = arith.truncf %31 : vector<32x32xf32> to vector<32x32xbf16>
    %c0_17 = arith.constant 0 : index
    %c0_18 = arith.constant 0 : index
    %33 = vector.load %arg5[%c0_17, %c0_18] : memref<32x128xbf16, #tpu.memory_space<vmem>>, vector<32x128xbf16>
    %cst_19 = arith.constant dense<0.000000e+00> : vector<32x128xf32>
    %34 = tpu.matmul %32, %33, %cst_19 {dimension_numbers = #tpu.dot_dimension_numbers<[1], [0], [0], [1], [0, 0, 1, 1], [], []>} : vector<32x32xbf16>, vector<32x128xbf16>, vector<32x128xf32> -> vector<32x128xf32>
    %c0_20 = arith.constant 0 : index
    %c0_21 = arith.constant 0 : index
    %35 = vector.load %arg6[%c0_20, %c0_21] : memref<1x128xf32, #tpu.memory_space<vmem>>, vector<1x128xf32>
    %36 = vector.broadcast %35 : vector<1x128xf32> to vector<32x128xf32>
    %37 = arith.addf %34, %36 : vector<32x128xf32>
    %38 = tpu.iota {dimensions = array<i32: 1>} : vector<32x128xi32>
    %c54_i32 = arith.constant 54 : i32
    %39 = vector.broadcast %c54_i32 : i32 to vector<32x128xi32>
    %40 = arith.cmpi sge, %38, %39 : vector<32x128xi32>
    %c63_i32 = arith.constant 63 : i32
    %41 = vector.broadcast %c63_i32 : i32 to vector<32x128xi32>
    %42 = arith.cmpi slt, %38, %41 : vector<32x128xi32>
    %43 = arith.andi %40, %42 : vector<32x128xi1>
    %cst_22 = arith.constant 0.000000e+00 : f32
    %44 = vector.broadcast %cst_22 : f32 to vector<32x128xf32>
    %45 = arith.select %43, %37, %44 : vector<32x128xi1>, vector<32x128xf32>
    %cst_23 = arith.constant 0.000000e+00 : f32
    %46 = vector.broadcast %cst_23 : f32 to vector<32x128xf32>
    %47 = arith.subf %46, %45 : vector<32x128xf32>
    %48 = math.exp %47 : vector<32x128xf32>
    %cst_24 = arith.constant 1.000000e+00 : f32
    %49 = vector.broadcast %cst_24 : f32 to vector<32x128xf32>
    %50 = arith.addf %49, %48 : vector<32x128xf32>
    %cst_25 = arith.constant 1.000000e+00 : f32
    %51 = vector.broadcast %cst_25 : f32 to vector<32x128xf32>
    %52 = arith.divf %51, %50 : vector<32x128xf32>
    %53 = arith.select %43, %52, %37 : vector<32x128xi1>, vector<32x128xf32>
    %c0_26 = arith.constant 0 : index
    %c0_27 = arith.constant 0 : index
    %c0_28 = arith.constant 0 : index
    %c0_29 = arith.constant 0 : index
    %54 = vector.load %arg7[%c0_26, %c0_27, %c0_28, %c0_29] : memref<1x1x32x128xf32, #tpu.memory_space<vmem>>, vector<1x1x32x128xf32>
    %55 = vector.shape_cast %54 : vector<1x1x32x128xf32> to vector<32x128xf32>
    %56 = vector.shape_cast %53 : vector<32x128xf32> to vector<1x1x32x128xf32>
    tpu.vector_store %arg7[%c0_26, %c0_27, %c0_28, %c0_29], %56 {strides = array<i32>} : memref<1x1x32x128xf32, #tpu.memory_space<vmem>>, vector<1x1x32x128xf32>,
    return
  }
  func.func @transform_0(%arg0: i32, %arg1: i32) -> (i32, i32, i32) {
    %c0_i32 = arith.constant 0 : i32
    %c0_i32_0 = arith.constant 0 : i32
    %c0_i32_1 = arith.constant 0 : i32
    return %arg0, %c0_i32, %c0_i32_0 : i32, i32, i32
  }
  func.func @transform_1(%arg0: i32, %arg1: i32) -> (i32, i32, i32) {
    %c0_i32 = arith.constant 0 : i32
    %c0_i32_0 = arith.constant 0 : i32
    %c0_i32_1 = arith.constant 0 : i32
    %c0_i32_2 = arith.constant 0 : i32
    return %c0_i32, %c0_i32_0, %c0_i32_1 : i32, i32, i32
  }
  func.func @transform_2(%arg0: i32, %arg1: i32) -> (i32, i32) {
    %c0_i32 = arith.constant 0 : i32
    %c0_i32_0 = arith.constant 0 : i32
    %c0_i32_1 = arith.constant 0 : i32
    return %c0_i32, %c0_i32_0 : i32, i32
  }
  func.func @transform_3(%arg0: i32, %arg1: i32) -> (i32, i32) {
    %c0_i32 = arith.constant 0 : i32
    %c0_i32_0 = arith.constant 0 : i32
    %c0_i32_1 = arith.constant 0 : i32
    return %c0_i32, %c0_i32_0 : i32, i32
  }
  func.func @transform_4(%arg0: i32, %arg1: i32) -> (i32, i32) {
    %c0_i32 = arith.constant 0 : i32
    %c0_i32_0 = arith.constant 0 : i32
    %c0_i32_1 = arith.constant 0 : i32
    return %c0_i32, %c0_i32_0 : i32, i32
  }
  func.func @transform_5(%arg0: i32, %arg1: i32) -> (i32, i32, i32, i32) {
    %c0_i32 = arith.constant 0 : i32
    %c0_i32_0 = arith.constant 0 : i32
    %c0_i32_1 = arith.constant 0 : i32
    return %arg0, %arg1, %c0_i32, %c0_i32_0 : i32, i32, i32, i32
  }
}

</mosaic_0001>

<bundles_post_ra>
// kernel: tpu_custom_call.1
= control target key start
LH: loop header
LB: loop body
LE: loop exit
PB: predicated region body
PF: predicated region fallthrough
CT: control target
= control target key end

     0   :  { %10 = vsyncpa [#allocation3], 0  ;;  %s1335_s0 = inlined_call_operand.vmem [shape: bf16[2,80,48], index: 0, kind: input, shape index: {}]   ;;  %s1336_s1 = inlined_call_operand.vmem [shape: bf16[3,48,32], index: 1, kind: input, shape index: {}]   ;;  %s1337_s2 = inlined_call_operand.vmem [shape: f32[1,32], index: 2, kind: input, shape index: {}]   ;;  %s1338_s3 = inlined_call_operand.vmem [shape: bf16[32,128], index: 3, kind: input, shape index: {}]   ;;  %s1339_s4 = inlined_call_operand.vmem [shape: f32[1,128], index: 4, kind: input, shape index: {}]   ;;  %s1340_s5 = inlined_call_operand.hbm [shape: f32[2,2,32,128], index: 5, kind: output, shape index: {}]  }
   0x1   :  { %12 = vsyncpa [#allocation3 + $0x1], 0  ;;  %s1131_s18 = smov 0   ;;  %s1133_s19 = smov 0  }
   0x2   :  { %s1135_s20 = smov 0   ;;  %s1137_s21 = smov 0  }
   0x3   :  { %s1139_s22 = smov 0   ;;  %s1141_s23 = smov 0  }
   0x4   :  { %s1143_s24 = smov 0   ;;  %s1145_s25 = smov 0  }
   0x5 LB: > { %1345 = sst [smem:[#allocation5_spill]] %s1088_s23  ;;  %s774_s26 = sadd.s32 4294967295, %s1096_s25   ;;  %s1096_s25 = sphi %s1145_s25, %s18_s25   ;;  %s1092_s24 = sphi %s1143_s24, %s1356_s24   ;;  %s1088_s23 = sphi %s1141_s23, %s1355_s23   ;;  %s1084_s22 = sphi %s1139_s22, %s1354_s22   ;;  %s1080_s21 = sphi %s1137_s21, %s1353_s21   ;;  %s1076_s20 = sphi %s1135_s20, %s1359_s20   ;;  %s1072_s19 = sphi %s1133_s19, %s1358_s19   ;;  %s1068_s18 = sphi %s1131_s18, %s1357_s18  }
   0x6   : > { %1346 = sst [smem:[#allocation6_spill]] %s1092_s24  ;;  %s775_s27 = sadd.s32 4294967294, %s1096_s25  }
   0x7   : > { %s27_s28 = sadd.s32 1, %s1088_s23  ;;  %s30_s29 = sadd.s32 1, %s1092_s24 }
   0x8   : > { %p28_p0 = scmp.ge.s32.totalorder %s27_s28, 2  ;;  %p159_p1 = scmp.ne.s32.totalorder %s1076_s20, %s1072_s19 }
   0x9   : > { %p160_p2 = scmp.eq.s32.totalorder %s774_s26, 3  ;;  %p165_p5 = scmp.ne.s32.totalorder %s1072_s19, %s1068_s18 }
   0xa   : > { %s1361_s28 = smov (%p28_p0, %s27_s28), 0  ;;  %s1363_s29 = smov (!%p28_p0, %s30_s29), %s1092_s24 }
   0xb   : > { %1347 = sst [smem:[#allocation7_spill]] %s1361_s28  ;;  %s145_s30 = ssub.s32 %s1088_s23, %s1361_s28 }
   0xc   : > { %p1182_p3 = por %p160_p2, %p159_p1  ;;  %p32_p4 = scmp.ge.s32.totalorder %s1363_s29, 2 }
   0xd   : > { %p166_p6 = scmp.eq.s32.totalorder %s775_s27, 3  ;;  %p778_p7 = scmp.ge.s32.totalorder %s1096_s25, 1 }
   0xe   : > { %s1365_s29 = smov (%p32_p4, %s1363_s29), 0  ;;  %p204_p9 = scmp.lt.s32.totalorder %s1096_s25, 5 }
   0xf   : > { %1349 = sst [smem:[#allocation8_spill]] %s1365_s29  ;;  %p1191_p8 = por %p166_p6, %p165_p5 }
  0x10   : > { %s144_s8 = ssub.s32 %s1092_s24, %s1365_s29  ;;  %s149_s9 = sadd.s32 1, %s1076_s20 }
  0x11   : > { %s146_s10 = sor.u32 %s145_s30, %s144_s8  ;;  %p205_p10 = pnand %p778_p7, %p204_p9 }
  0x12   : > { %p147_p11 = scmp.eq.s32.totalorder %s146_s10, 0  ;;  %v969_v0 = vld [vmem:[%s1336_s1] sm:$0xff] (!%p205_p10)   ;;  %p232_p12 = scmp.lt.s32.totalorder (!%p205_p10), %s1084_s22, 1  ;;  %v970_v1 = vld [vmem:[%s1336_s1 + $0x8] sm:$0xff] (!%p205_p10)   ;;  %v972_v2 = vld [vmem:[%s1336_s1 + $0x18] sm:$0xff] (!%p205_p10)   ;;  %vm297_vm0 = vcmask (!%p205_p10), 392192   ;;  %v635_v40 = vlaneseq (!%p205_p10) }
  0x13   : > { %208 = sbr.rel (%p205_p10) target bundleno = 532 (0x214), region = 40  ;;  %s781_s16 = sshll.u32 (!%p205_p10), %s1080_s21, 5  ;;  %859 = vmatprep.subr.bf16.mxu0 (!%p205_p10), %v969_v0  ;;  %v971_v3 = vld [vmem:[%s1336_s1 + $0x10] sm:$0xff] (!%p205_p10)   ;;  %849 = vmatprep.subr.bf16.mxu1 (!%p205_p10), %v972_v2  ;;  %v976_v4 = vld [vmem:[%s1336_s1 + $0x20] sm:$0xff] (!%p205_p10)   ;;  %v978_v6 = vld [vmem:[%s1336_s1 + $0x28] sm:$0xff] (!%p205_p10)   ;;  %vm579_vm1 = vcmask (!%p205_p10), 261120  }
  0x14   : > { %s1200_s11 = scalar_select %p147_p11, %s1076_s20, %s149_s9  }
  0x15   : > { %860 = vmatpush3.bf16.msra.mxu0 (!%p205_p10), %v969_v0  ;;  %s239_s30 = sshra.s32 (!%p205_p10), %s781_s16, 3  ;;  %s436_s13 = sadd.s32 (!%p205_p10), 16, %s781_s16  ;;  %850 = vmatpush3.bf16.msra.mxu1 (!%p205_p10), %v972_v2  ;;  %v975_v5 = vld [vmem:[%s1336_s1 + $0x30] sm:$0xff] (!%p205_p10)   ;;  %v977_v9 = vld [vmem:[%s1336_s1 + $0x38] sm:$0xff] (!%p205_p10)   ;;  %v979_v13 = vld [vmem:[%s1336_s1 + $0x40] sm:$0xff] (!%p205_p10)   ;;  %v636_v41 = vand.u32 (!%p205_p10), 127, %v635_v40 }
  0x16   : > { %861 = vmatprep.subr.bf16.mxu0 (!%p205_p10), %v970_v1  ;;  %s782_s12 = sshll.u32 (!%p205_p10), %s239_s30, 2  ;;  %s437_s27 = sshra.s32 (!%p205_p10), %s436_s13, 3  ;;  %851 = vmatprep.subr.bf16.mxu1 (!%p205_p10), %v976_v4  ;;  %v984_v15 = vld [vmem:[%s1338_s3] sm:$0xff] (!%p205_p10)   ;;  %v985_v16 = vld [vmem:[%s1338_s3 + $0x8] sm:$0xff] (!%p205_p10)  }
  0x17   : > { %s804_s30 = sshll.u32 (!%p205_p10), %s437_s27, 2  ;;  %s253_s14 = sadd.s32 (!%p205_p10), 8, %s781_s16  ;;  %v818_v22 = vld [vmem:[%s1337_s2] ss:$0 sm:$0xff] (!%p205_p10)  ;;  %vm637_vm2 = vcmp.ge.s32.totalorder (!%p205_p10), %v636_v41, 54  ;;  %vm638_vm3 = vcmp.lt.s32.totalorder (!%p205_p10), %v636_v41, 63 }
  0x18   : > { %s254_s28 = sshra.s32 (!%p205_p10), %s253_s14, 3  ;;  %v819_v42 = vld [vmem:[%s1339_s4] ss:$0 sm:$0xff] (!%p205_p10)  ;;  %vm1253_vm4 = vmand (!%p205_p10), %vm637_vm2, %vm638_vm3  ;;  %s826_s23 = sshll.u32 (!%p205_p10), %s1084_s22, 3 }
  0x19   : > { %862 = vmatpush3.bf16.msra.mxu0 (!%p205_p10), %v970_v1  ;;  %852 = vmatpush3.bf16.msra.mxu1 (!%p205_p10), %v976_v4  ;;  %s783_s29 = sshll.u32 (!%p205_p10), %s254_s28, 2  ;;  %s825_s28 = sshll.u32 (!%p205_p10), %s1080_s21, 2 }
  0x1a   : > { %s233_s17 = scalar_select %p232_p12, %s1084_s22, 1  ;;  %863 = vmatprep.subr.bf16.mxu0 %v971_v3  ;;  %853 = vmatprep.subr.bf16.mxu1 %v978_v6 }
  0x1c   : > { %s895_s10 = smul.u32 40, %s233_s17 }
  0x1d   : > { %864 = vmatpush3.bf16.msra.mxu0 %v971_v3  ;;  %854 = vmatpush3.bf16.msra.mxu1 %v978_v6 }
  0x1e   : > { %s236_s26 = scalar_lea.vmem %s1335_s0, %s895_s10  ;;  %869 = vmatprep.subr.bf16.mxu0 %v975_v5  ;;  %879 = vmatprep.subr.bf16.mxu1 %v984_v15 }
  0x1f   : > { %s242_s17 = scalar_lea.vmem %s236_s26, %s782_s12  ;;  %s440_s15 = scalar_lea.vmem %s236_s26, %s804_s30 }
  0x20   : > { %v973_v7 = vld [vmem:[%s242_s17] sm:$0xff]   ;;  %v974_v8 = vld [vmem:[%s242_s17 + $0x8] sm:$0xff]   ;;  %s257_s10 = scalar_lea.vmem %s236_s26, %s783_s29  ;;  %s689_s29 = sadd.s32 %s826_s23, %s825_s28 }
  0x21   : > { %865 = vmatprep.mubr.msk.bf16.mxu0 %vm297_vm0, %v973_v7  ;;  %v982_v10 = vld [vmem:[%s440_s15] sm:$0xff]   ;;  %v981_v12 = vld [vmem:[%s257_s10 + $0x8] sm:$0xff]   ;;  %s827_s12 = sshll.u32 %s689_s29, 7  ;;  %s1098_s17 = smov [#allocation2]  }
  0x22   : > { %v980_v11 = vld [vmem:[%s257_s10] sm:$0xff]   ;;  %866 = vmatmul.mubr.msk.bf16.vlgmr.msra.gmra.mrb[0].mxu0 %vm297_vm0, %v974_v8  ;;  %v983_v14 = vld [vmem:[%s440_s15 + $0x8] sm:$0xff]   ;;  %s229_s15 = sand.u32 1, %s1072_s19   ;;  %s1279_s13 = scalar_lea.hbm %s1340_s5, %s827_s12 }
  0x23   : > { %870 = vmatpush3.bf16.msra.mxu0 %v975_v5  ;;  %855 = vmatprep.mubr.msk.bf16.mxu1 %vm297_vm0, %v980_v11  ;;  %s779_s24 = sshll.u32 %s229_s15, 5  ;;  %s1283_s26 = scalar_lea.sflag [#allocation3], %s229_s15 }
  0x24   : > { %871 = vmatprep.subr.bf16.mxu0 %v977_v9  ;;  %875 = vmatprep.mubr.msk.bf16.mxu0 %vm297_vm0, %v982_v10  ;;  %s231_s10 = scalar_lea.vmem [#allocation2], %s779_s24  ;;  %s1006_s30 = sshll.u32 %s1098_s17, 4  ;;  %s1007_s30 = int_to_ptr.vmem [resolvable:$false] %s1006_s30 }
  0x25   : > { %856 = vmatmul.mubr.msk.bf16.vlgmr.msra.gmra.mrb[0].mxu1 %vm297_vm0, %v981_v12  ;;  %s692_s16 = sshll.u32 %s231_s10, 4  ;;  %s1008_s8 = scalar_lea.vmem %s1007_s30, 1024  ;;  %s1270_s16 = int_to_ptr.vmem [resolvable:$true] %s692_s16 }
  0x26   : > { %880 = vmatpush3.bf16.msra.mxu1 %v984_v15  ;;  %s1002_s27 = scalar_lea.vmem %s1270_s16, 512  ;;  %p1009_p2 = scmp.lt.s32.totalorder %s1270_s16, %s1007_s30 }
  0x27   : > { %872 = vmatpush3.bf16.msra.mxu0 %v977_v9  ;;  %881 = vmatprep.subr.bf16.mxu1 %v985_v16  ;;  %p1003_p13 = scmp.ne.s32.totalorder %s1270_s16, %s1002_s27  ;;  %p1010_p4 = scmp.lt.s32.totalorder %s1008_s8, %s1002_s27 }
  0x28   : > { %873 = vmatprep.subr.bf16.mxu0 %v979_v13 }
  0x29   : > { %p1004_p0 = pnand %p1003_p13, %p1182_p3  ;;  %p1011_p5 = por %p1010_p4, %p1009_p2 }
  0x2a   : > { %882 = vmatpush3.bf16.msra.mxu1 %v985_v16 }
  0x2b   : > { %874 = vmatpush3.bf16.msra.mxu0 %v979_v13  ;;  %p1005_p1 = pneg %p1004_p0 }
  0x2d   : > { %p1012_p6 = pnand %p1011_p5, %p1005_p1 }
  0x2e   : > { %876 = vmatmul.mubr.msk.bf16.vlgmr.msra.gmra.mrb[0].mxu0 %vm297_vm0, %v983_v14 }
  0xf8   : > { %v857_v17 = vpop.f32.mrb[0].mxu1 }
  0xf9   : > { %v338_v18 = vpop.f32.mrb[1].mxu1 }
  0xfa   : > { %v858_v19 = vpop.f32.mrb[2].mxu1 }
  0xfb   : > { %v341_v20 = vpop.f32.mrb[3].mxu1 }
 0x101   : > { %v877_v21 = vpop.f32.mrb[0].mxu0 }
 0x102   : > { %v887_v23 = vadd.f32 %v877_v21, %v857_v17  ;;  %v520_v24 = vpop.f32.mrb[1].mxu0 }
 0x103   : > { %v888_v25 = vadd.f32 %v520_v24, %v338_v18  ;;  %v878_v26 = vpop.f32.mrb[2].mxu0 }
 0x104   : > { %v548_v27 = vadd.f32 %v887_v23, %v818_v22  ;;  %v889_v28 = vadd.f32 %v878_v26, %v858_v19  ;;  %v523_v29 = vpop.f32.mrb[3].mxu0 }
 0x105   : > { %v546_v30 = vadd.f32 %v888_v25, %v818_v22  ;;  %v890_v31 = vadd.f32 %v523_v29, %v341_v20 }
 0x106   : > { %v549_v32 = vadd.f32 %v889_v28, %v818_v22  ;;  %v552_v34 = vmax.f32 %v548_v27, 0.0 }
 0x107   : > { %v547_v33 = vadd.f32 %v890_v31, %v818_v22  ;;  %v550_v36 = vmax.f32 %v546_v30, 0.0 }
 0x108   : > { %v553_v35 = vmax.f32 %v549_v32, 0.0 }
 0x109   : > { %v551_v37 = vmax.f32 %v547_v33, 0.0 }
 0x10a   : > { %v555_v38 = vpack.c.bf16 %v553_v35, %v552_v34 }
 0x10b   : > { %v554_v39 = vpack.c.bf16 %v551_v37, %v550_v36 }
 0x10d   : > { %883 = vmatprep.mubr.msk.bf16.mxu1 %vm579_vm1, %v554_v39 }
 0x10e   : > { %884 = vmatmul.mubr.msk.bf16.vlgmr.msra.gmra.mrb[4].mxu1 %vm579_vm1, %v555_v38 }
 0x1e1   : > { %v885_v43 = vpop.f32.mrb[4].mxu1 }
 0x1e2   : > { %v629_v45 = vadd.f32 %v885_v43, %v819_v42  ;;  %v620_v46 = vpop.f32.mrb[5].mxu1 }
 0x1e3   : > { %v621_v47 = vadd.f32 %v819_v42, %v620_v46  ;;  %v886_v48 = vpop.f32.mrb[6].mxu1 }
 0x1e4   : > { %v642_v49 = vsel %vm1253_vm4, %v629_v45, 0.0  ;;  %v632_v50 = vadd.f32 %v886_v48, %v819_v42  ;;  %v623_v51 = vpop.f32.mrb[7].mxu1 }
 0x1e5   : > { %v646_v52 = vsub.f32 0.0, %v642_v49  ;;  %v640_v53 = vsel %vm1253_vm4, %v621_v47, 0.0  ;;  %v624_v54 = vadd.f32 %v819_v42, %v623_v51 }
 0x1e6   : > { %v644_v55 = vsub.f32 0.0, %v640_v53  ;;  %v643_v56 = vsel %vm1253_vm4, %v632_v50, 0.0 }
 0x1e7   : > { %v652_v57 = vmul.f32 1.442695, %v646_v52  ;;  %v647_v58 = vsub.f32 0.0, %v643_v56  ;;  %v641_v59 = vsel %vm1253_vm4, %v624_v54, 0.0 }
 0x1e8   : > { %v648_v60 = vmul.f32 1.442695, %v644_v55  ;;  %v645_v61 = vsub.f32 0.0, %v641_v59 }
 0x1e9   : > { %986 = vpow2.f32 %v652_v57  ;;  %v654_v62 = vmul.f32 1.442695, %v647_v58 }
 0x1ea   : > { %988 = vpow2.f32 %v648_v60  ;;  %v650_v63 = vmul.f32 1.442695, %v645_v61 }
 0x1eb   : > { %990 = vpow2.f32 %v654_v62 }
 0x1ec   : > { %992 = vpow2.f32 %v650_v63 }
 0x1f3   : > { %v987_v0 = vpop.eup %986 }
 0x1f4   : > { %v989_v1 = vpop.eup %988  ;;  %v658_v2 = vadd.f32 1.0, %v987_v0 }
 0x1f5   : > { %v991_v3 = vpop.eup %990  ;;  %v656_v4 = vadd.f32 1.0, %v989_v1 }
 0x1f6   : > { %v993_v5 = vpop.eup %992  ;;  %994 = vrcp.f32 %v658_v2  ;;  %v659_v6 = vadd.f32 1.0, %v991_v3 }
 0x1f7   : > { %996 = vrcp.f32 %v656_v4  ;;  %v657_v7 = vadd.f32 1.0, %v993_v5 }
 0x1f8   : > { %998 = vrcp.f32 %v659_v6 }
 0x1f9   : > { %1000 = vrcp.f32 %v657_v7 }
 0x200   : > { %v995_v8 = vpop.eup %994 }
 0x201   : > { %v997_v9 = vpop.eup %996  ;;  %v670_v10 = vsel %vm1253_vm4, %v995_v8, %v629_v45 }
 0x202   : > { %v999_v11 = vpop.eup %998  ;;  %674 = vst [vmem:[%s231_s10 + $0x10] sm:$0xff] %v670_v10  ;;  %v668_v12 = vsel %vm1253_vm4, %v997_v9, %v621_v47 }
 0x203   : > { %v1001_v13 = vpop.eup %1000  ;;  %672 = vst [vmem:[%s231_s10] sm:$0xff] %v668_v12  ;;  %v671_v14 = vsel %vm1253_vm4, %v999_v11, %v632_v50 }
 0x204   : > { %675 = vst [vmem:[%s231_s10 + $0x18] sm:$0xff] %v671_v14  ;;  %v669_v15 = vsel %vm1253_vm4, %v1001_v13, %v624_v54 }
 0x205   : > { %673 = vst [vmem:[%s231_s10 + $0x8] sm:$0xff] %v669_v15 }
 0x206   : > { %1015 = shalt.err (!%p1012_p6)
}
 0x207   : > { %s1016_s9 = scalar_lea.hbm %s1279_s13, 512  ;;  %s1020_s28 = scalar_lea.hbm %s1340_s5, 2048 }
 0x208   : > { %p1017_p7 = scmp.ne.s32.totalorder %s1279_s13, %s1016_s9  ;;  %p1021_p11 = scmp.lt.u32.totalorder %s1279_s13, %s1340_s5 }
 0x209   : > { %p1022_p12 = scmp.lt.u32.totalorder %s1020_s28, %s1016_s9  ;;  %p1024_p0 = scmp.lt.u32.totalorder %s1016_s9, %s1279_s13 }
 0x20a   : > { %p1018_p9 = pnand %p1017_p7, %p1182_p3 }
 0x20b   : > { %p1023_p13 = por %p1022_p12, %p1021_p11 }
 0x20c   : > { %p1019_p10 = pneg %p1018_p9 }
 0x20d   : > { %p1025_p1 = por %p1024_p0, %p1023_p13 }
 0x20f   : > { %p1026_p2 = pnand %p1025_p1, %p1019_p10 }
 0x211   : > { %1029 = shalt.err (!%p1026_p2)
}
 0x212   : > { %s1099_s29 = smov 128   ;;  %s1100_s10 = smov 8  }
 0x213   : > { %896 = dma.vmem_to_hbm [thread:$0]  (%p1182_p3), %s1270_s16, 512, %s1279_s13, %s1283_s26, %s1099_s29, %s1099_s29, %s1100_s10  }
 0x214 PF: > { %p902_p4 = scmp.ge.s32.totalorder %s1096_s25, 2  ;;  %s707_s12 = sand.u32 1, %s1068_s18  }
 0x215   : > { %s708_s21 = scalar_lea.sflag [#allocation3], %s707_s12 }
 0x216   : > { %p899_p5 = pnand %p902_p4, %p1191_p8 }
 0x218   : > { %1063 = dma.done.wait (!%p899_p5), %s708_s21, 512  }
 0x219   : > { %1065 = vsyncadd (!%p899_p5), %s708_s21, 4294966784  ;;  %s18_s25 = sadd.s32 1, %s1096_s25   ;;  %s1353_s21 = sld [smem:[#allocation5_spill]] }
 0x21a   : > { %p15_p6 = scmp.ge.s32.totalorder %s18_s25, 6   ;;  %s1354_s22 = sld [smem:[#allocation6_spill]] }
 0x21b   : > { %s1355_s23 = sld [smem:[#allocation7_spill]]  ;;  %s1356_s24 = sld [smem:[#allocation8_spill]] }
 0x21c   : > { %s1357_s18 = smov %s1072_s19  ;;  %s1358_s19 = smov %s1076_s20 }
 0x21d   : > { %s1359_s20 = smov %s1200_s11  ;;  %17 = sbr.rel (!%p15_p6) target bundleno = 5 (0x5), region = 80 }
 0x224   :  { %713 = vsyncpa [#allocation3], 1 }
 0x225   :  { %715 = vsyncpa [#allocation3 + $0x1], 1 }

</bundles_post_ra>
